<compile_context>
chip_gen: v7x
topology: tpu7x:2x2x1
jax: 0.10.0
libtpu: 0.0.40
codegen_flags: <defaults>
</compile_context>

<pallas_src>
import jax
import jax.numpy as jnp
from jax.experimental import pallas as pl
from jax.experimental.pallas import tpu as pltpu

_LANE = 128
_SUBLANE = 8


def _round_up(x, m):
    return (x + m - 1) // m * m


def _lane_pad(n):
    return _round_up(max(int(n), 1), _LANE)


def _pick_group(b):
    """Batch rows packed into one lane-dense row (8 when the batch allows)."""
    for g in (8, 4, 2):
        if b % g == 0:
            return g
    return 1


def _mlp_kernel(e1_ref, e2_ref, w1l_ref, w1r_ref, b1_ref, w2_ref, b2_ref, o_ref):
    """One batch tile of the packed MLP.

    e1_ref : (TR, G*l_dim)     e2_ref : (TR, G*r_dim)      [stream dtype]
    w1l_ref: (G*l_dim, G*H)    w1r_ref: (G*r_dim, G*H)     [stream dtype, block-diag]
    b1_ref : (1, G*H)  f32     w2_ref : (G*H, G)  f32 (block-diag column weights)
    b2_ref : (1,) f32 in SMEM  o_ref  : (TR, G)
    Packed row r, slot b  <->  batch row G*r + b.
    """
    h = jnp.dot(e1_ref[...], w1l_ref[...], preferred_element_type=jnp.float32)
    h = h + jnp.dot(e2_ref[...], w1r_ref[...], preferred_element_type=jnp.float32)
    h = jnp.maximum(h + b1_ref[...], 0.0)                             # bias + ReLU, f32
    y = jnp.dot(h, w2_ref[...], preferred_element_type=jnp.float32)   # (TR, G)
    o_ref[...] = (y + b2_ref[0]).astype(o_ref.dtype)


def mlp_forward(e1, e2, w1, b1, w2, b2, *, block_batch=None, stream_dtype=None):
    """e1: (B, l_dim), e2: (B, r_dim) -> (B, 1), matching the PyTorch MLP.

    w1: (l_dim + r_dim, H) (already transposed to (in, out)); b1: (H,);
    w2: (H, 1); b2: (1,).

    stream_dtype: optional dtype (e.g. jnp.bfloat16) for streaming e1/e2/W1.
      Note: casting f32 inputs here costs an extra HBM pass over the
      activations; it pays off when the producer already emits that dtype.
    """
    B, l_dim = e1.shape
    B2, r_dim = e2.shape
    assert B == B2, "e1/e2 batch mismatch"
    H = w1.shape[1]
    assert w1.shape[0] == l_dim + r_dim

    out_dtype = e1.dtype
    if stream_dtype is not None:
        e1 = e1.astype(stream_dtype)
        e2 = e2.astype(stream_dtype)
    act_dtype = e1.dtype
    itemsize = jnp.dtype(act_dtype).itemsize
    out_itemsize = jnp.dtype(out_dtype).itemsize

    # ---- batch-on-lanes packing (lane-dense activation blocks) --------------
    G = _pick_group(B)
    R = B // G                         # packed rows; one row = G batch rows
    e1p = e1.reshape(R, G * l_dim)     # free (contiguous row-major) reshape
    e2p = e2.reshape(R, G * r_dim)

    eye = jnp.eye(G, dtype=jnp.float32)
    w1l_blk = jnp.kron(eye, w1[:l_dim].astype(jnp.float32)).astype(act_dtype)
    w1r_blk = jnp.kron(eye, w1[l_dim:].astype(jnp.float32)).astype(act_dtype)
    b1_blk = jnp.tile(b1.astype(jnp.float32), G).reshape(1, G * H)
    w2_blk = jnp.kron(eye, w2.astype(jnp.float32).reshape(H, 1))        # (G*H, G) f32
    b2_s = b2.astype(jnp.float32).reshape(1,)

    # ---- batch-tile sizing ---------------------------------------------------
    row_gran = _SUBLANE * max(1, 4 // itemsize)      # sublane packing granularity
    hbm_per_row = G * (l_dim + r_dim) * itemsize + G * out_itemsize
    vmem_per_row = (2 * (_lane_pad(G * l_dim) + _lane_pad(G * r_dim)) * itemsize
                    + 2 * _lane_pad(G) * out_itemsize)  # double-buffered in/out
    if block_batch is None:
        # ~4 MiB of real HBM traffic per grid step amortizes the ~0.35 us
        # fixed per-step pipeline overhead.
        TR = max(row_gran, (4 << 20) // max(hbm_per_row, 1))
        # Keep double-buffered activation blocks inside scoped VMEM, sized
        # against the real lane-padded footprint.
        while TR > row_gran and TR * vmem_per_row > (20 << 20):
            TR //= 2
        # v7x: leave >= ~8 grid steps for large batches so both TensorCores
        # get >= 4 tiles under dimension_semantics=("parallel",).
        TR = min(TR, _round_up(pl.cdiv(R, 8), row_gran))
        # Never larger than one pass over the whole (packed) batch.
        TR = min(TR, _round_up(R, row_gran))
        TR = max(row_gran, _round_up(TR, row_gran))
    else:
        TR = max(row_gran, _round_up(pl.cdiv(block_batch, G), row_gran))

    # No jnp.pad of the activations: the partial last tile relies on Pallas
    # block semantics (OOB reads only feed output rows that are write-masked).
    grid = (pl.cdiv(R, TR),)

    # Explicit scoped-VMEM limit (v5e default is only 16 MiB), with headroom,
    # capped at 32 MiB for v7x's 64 MiB physical VMEM.
    w_vmem = 2 * itemsize * _lane_pad(G * H) * (
        _round_up(G * l_dim, _SUBLANE) + _round_up(G * r_dim, _SUBLANE))
    w_vmem += 2 * 4 * (_round_up(G * H, _SUBLANE) * _lane_pad(G)
                       + _SUBLANE * _lane_pad(G * H))
    est_vmem = TR * vmem_per_row + w_vmem
    vmem_limit = int(min(32 << 20, max(16 << 20, est_vmem + (8 << 20))))

    steps = grid[0]
    cost = pl.CostEstimate(
        flops=int(steps * (2 * TR * (G * l_dim) * (G * H)
                           + 2 * TR * (G * r_dim) * (G * H)
                           + 2 * TR * (G * H) * G)),
        transcendentals=0,
        bytes_accessed=int(B * (l_dim + r_dim) * itemsize
                           + (w1l_blk.size + w1r_blk.size) * itemsize
                           + (b1_blk.size + w2_blk.size + 1) * 4
                           + B * out_itemsize),
    )

    out_packed = pl.pallas_call(
        _mlp_kernel,
        out_shape=jax.ShapeDtypeStruct((R, G), out_dtype),
        grid=grid,
        in_specs=[
            pl.BlockSpec((TR, G * l_dim), lambda i: (i, 0)),        # e1 tile (lane-dense)
            pl.BlockSpec((TR, G * r_dim), lambda i: (i, 0)),        # e2 tile (lane-dense)
            pl.BlockSpec((G * l_dim, G * H), lambda i: (0, 0)),     # W1[:l] block-diag
            pl.BlockSpec((G * r_dim, G * H), lambda i: (0, 0)),     # W1[l:] block-diag
            pl.BlockSpec((1, G * H), lambda i: (0, 0)),             # b1 tiled
            pl.BlockSpec((G * H, G), lambda i: (0, 0)),             # W2 block-diag (f32)
            pl.BlockSpec(memory_space=pltpu.MemorySpace.SMEM),      # b2 scalar
        ],
        out_specs=pl.BlockSpec((TR, G), lambda i: (i, 0)),
        compiler_params=pltpu.CompilerParams(
            dimension_semantics=("parallel",),
            vmem_limit_bytes=vmem_limit),
        cost_estimate=cost,
    )(e1p, e2p, w1l_blk, w1r_blk, b1_blk, w2_blk, b2_s)

    # (R, G) in row-major order is exactly batch order -> free reshape.
    return out_packed.reshape(B, 1)


def init_params(key, l_dim, r_dim, hidden_dim, dtype=jnp.float32):
    """Deterministic init mimicking nn.Linear's uniform(-1/sqrt(fan_in), ...).
    Weights are returned already transposed to (in, out)."""
    d_in = l_dim + r_dim
    k1, k2, k3, k4 = jax.random.split(key, 4)
    lim1 = 1.0 / jnp.sqrt(d_in)
    lim2 = 1.0 / jnp.sqrt(hidden_dim)
    w1 = jax.random.uniform(k1, (d_in, hidden_dim), dtype, -lim1, lim1)
    b1 = jax.random.uniform(k2, (hidden_dim,), dtype, -lim1, lim1)
    w2 = jax.random.uniform(k3, (hidden_dim, 1), dtype, -lim2, lim2)
    b2 = jax.random.uniform(k4, (1,), dtype, -lim2, lim2)
    return w1, b1, w2, b2


if __name__ == "__main__":
    l_dim, r_dim, hidden_dim = 16, 16, 32

    key = jax.random.PRNGKey(0)
    k1, k2, k3, k4, k5, k6, kp = jax.random.split(key, 7)
    w1, b1, w2, b2 = init_params(kp, l_dim, r_dim, hidden_dim)

    def reference(a, c):
        x = jnp.concatenate([a, c], axis=1)
        return jnp.maximum(x @ w1 + b1, 0.0) @ w2 + b2

    # Case 1: batch divisible by 8 -> fully lane-dense packed path (G=8).
    batch = 64
    e1 = jax.random.normal(k1, (batch, l_dim), jnp.float32)
    e2 = jax.random.normal(k2, (batch, r_dim), jnp.float32)
    out = mlp_forward(e1, e2, w1, b1, w2, b2)
    jax.block_until_ready(out)
    ref = reference(e1, e2)
    assert out.shape == (batch, 1)
    assert jnp.allclose(out, ref, atol=2e-4, rtol=2e-4), (
        float(jnp.max(jnp.abs(out - ref))))

    # Case 2: batch not divisible by 2 -> G=1 fallback, partial trailing grid
    # tile exercised with no jnp.pad (OOB rows are write-masked by Pallas).
    batch2 = 13
    e3 = jax.random.normal(k3, (batch2, l_dim), jnp.float32)
    e4 = jax.random.normal(k4, (batch2, r_dim), jnp.float32)
    out2 = mlp_forward(e3, e4, w1, b1, w2, b2)
    jax.block_until_ready(out2)
    ref2 = reference(e3, e4)
    assert out2.shape == (batch2, 1)
    assert jnp.allclose(out2, ref2, atol=2e-4, rtol=2e-4), (
        float(jnp.max(jnp.abs(out2 - ref2))))

    # Case 3: opt-in bf16 activation/W1 stream, f32 accumulation.  Compare
    # against a reference with bf16-rounded inputs/W1 (same quantization).
    batch3 = 128
    e5 = jax.random.normal(k5, (batch3, l_dim), jnp.float32)
    e6 = jax.random.normal(k6, (batch3, r_dim), jnp.float32)
    out3 = mlp_forward(e5, e6, w1, b1, w2, b2, stream_dtype=jnp.bfloat16)
    jax.block_until_ready(out3)

    def bf16_round(a):
        return a.astype(jnp.bfloat16).astype(jnp.float32)

    x_bf = jnp.concatenate([bf16_round(e5), bf16_round(e6)], axis=1)
    ref3 = jnp.maximum(x_bf @ bf16_round(w1) + b1, 0.0) @ w2 + b2
    assert out3.shape == (batch3, 1)
    assert jnp.allclose(out3, ref3, atol=5e-3, rtol=5e-3), (
        float(jnp.max(jnp.abs(out3 - ref3))))

    print("KERNEL_OK")
</pallas_src>

<mosaic_0001>
module attributes {stable_mosaic.version = 11 : i64} {
  func.func @_mlp_kernel(%arg0: i32, %arg1: memref<8x128xf32, #tpu.memory_space<vmem>>, %arg2: memref<8x128xf32, #tpu.memory_space<vmem>>, %arg3: memref<128x256xf32, #tpu.memory_space<vmem>>, %arg4: memref<128x256xf32, #tpu.memory_space<vmem>>, %arg5: memref<1x256xf32, #tpu.memory_space<vmem>>, %arg6: memref<256x8xf32, #tpu.memory_space<vmem>>, %arg7: memref<1xf32, #tpu.memory_space<smem>>, %arg8: memref<8x8xf32, #tpu.memory_space<vmem>>) attributes {dimension_semantics = [#tpu.dimension_semantics<parallel>], iteration_bounds = array<i64: 1>, scalar_prefetch = 0 : i64, scratch_operands = 0 : i64, tpu.core_type = #tpu.core_type<tc>, window_params = [{transform_indices = @transform_0, window_bounds = array<i64: 8, 128>}, {transform_indices = @transform_1, window_bounds = array<i64: 8, 128>}, {pipeline_mode = #tpu.pipeline_mode<synchronous>, transform_indices = @transform_2, window_bounds = array<i64: 128, 256>}, {pipeline_mode = #tpu.pipeline_mode<synchronous>, transform_indices = @transform_3, window_bounds = array<i64: 128, 256>}, {pipeline_mode = #tpu.pipeline_mode<synchronous>, transform_indices = @transform_4, window_bounds = array<i64: 1, 256>}, {pipeline_mode = #tpu.pipeline_mode<synchronous>, transform_indices = @transform_5, window_bounds = array<i64: 256, 8>}, {transform_indices = @transform_6, window_bounds = array<i64: 1>}, {transform_indices = @transform_7, window_bounds = array<i64: 8, 8>}]} {
    %c0 = arith.constant 0 : index
    %c0_0 = arith.constant 0 : index
    %0 = vector.load %arg1[%c0, %c0_0] : memref<8x128xf32, #tpu.memory_space<vmem>>, vector<8x128xf32>
    %c0_1 = arith.constant 0 : index
    %c0_2 = arith.constant 0 : index
    %1 = vector.load %arg3[%c0_1, %c0_2] : memref<128x256xf32, #tpu.memory_space<vmem>>, vector<128x256xf32>
    %cst = arith.constant dense<0.000000e+00> : vector<8x256xf32>
    %2 = tpu.matmul %0, %1, %cst {dimension_numbers = #tpu.dot_dimension_numbers<[1], [0], [0], [1], [0, 0, 1, 1], [], []>} : vector<8x128xf32>, vector<128x256xf32>, vector<8x256xf32> -> vector<8x256xf32>
    %c0_3 = arith.constant 0 : index
    %c0_4 = arith.constant 0 : index
    %3 = vector.load %arg2[%c0_3, %c0_4] : memref<8x128xf32, #tpu.memory_space<vmem>>, vector<8x128xf32>
    %c0_5 = arith.constant 0 : index
    %c0_6 = arith.constant 0 : index
    %4 = vector.load %arg4[%c0_5, %c0_6] : memref<128x256xf32, #tpu.memory_space<vmem>>, vector<128x256xf32>
    %cst_7 = arith.constant dense<0.000000e+00> : vector<8x256xf32>
    %5 = tpu.matmul %3, %4, %cst_7 {dimension_numbers = #tpu.dot_dimension_numbers<[1], [0], [0], [1], [0, 0, 1, 1], [], []>} : vector<8x128xf32>, vector<128x256xf32>, vector<8x256xf32> -> vector<8x256xf32>
    %6 = arith.addf %2, %5 : vector<8x256xf32>
    %c0_8 = arith.constant 0 : index
    %c0_9 = arith.constant 0 : index
    %7 = vector.load %arg5[%c0_8, %c0_9] : memref<1x256xf32, #tpu.memory_space<vmem>>, vector<1x256xf32>
    %8 = vector.broadcast %7 : vector<1x256xf32> to vector<8x256xf32>
    %9 = arith.addf %6, %8 : vector<8x256xf32>
    %cst_10 = arith.constant 0.000000e+00 : f32
    %10 = vector.broadcast %cst_10 : f32 to vector<8x256xf32>
    %11 = arith.maximumf %9, %10 : vector<8x256xf32>
    %c0_11 = arith.constant 0 : index
    %c0_12 = arith.constant 0 : index
    %12 = vector.load %arg6[%c0_11, %c0_12] : memref<256x8xf32, #tpu.memory_space<vmem>>, vector<256x8xf32>
    %cst_13 = arith.constant dense<0.000000e+00> : vector<8x8xf32>
    %13 = tpu.matmul %11, %12, %cst_13 {dimension_numbers = #tpu.dot_dimension_numbers<[1], [0], [0], [1], [0, 0, 1, 1], [], []>} : vector<8x256xf32>, vector<256x8xf32>, vector<8x8xf32> -> vector<8x8xf32>
    %c0_14 = arith.constant 0 : index
    %14 = memref.load %arg7[%c0_14] : memref<1xf32, #tpu.memory_space<smem>>
    %15 = vector.broadcast %14 : f32 to vector<8x8xf32>
    %16 = arith.addf %13, %15 : vector<8x8xf32>
    %c0_15 = arith.constant 0 : index
    %c0_16 = arith.constant 0 : index
    %17 = vector.load %arg8[%c0_15, %c0_16] : memref<8x8xf32, #tpu.memory_space<vmem>>, vector<8x8xf32>
    tpu.vector_store %arg8[%c0_15, %c0_16], %16 {strides = array<i32>} : memref<8x8xf32, #tpu.memory_space<vmem>>, vector<8x8xf32>,
    return
  }
  func.func @transform_0(%arg0: i32) -> (i32, i32) {
    %c0_i32 = arith.constant 0 : i32
    %c0_i32_0 = arith.constant 0 : i32
    return %arg0, %c0_i32 : i32, i32
  }
  func.func @transform_1(%arg0: i32) -> (i32, i32) {
    %c0_i32 = arith.constant 0 : i32
    %c0_i32_0 = arith.constant 0 : i32
    return %arg0, %c0_i32 : i32, i32
  }
  func.func @transform_2(%arg0: i32) -> (i32, i32) {
    %c0_i32 = arith.constant 0 : i32
    %c0_i32_0 = arith.constant 0 : i32
    %c0_i32_1 = arith.constant 0 : i32
    return %c0_i32, %c0_i32_0 : i32, i32
  }
  func.func @transform_3(%arg0: i32) -> (i32, i32) {
    %c0_i32 = arith.constant 0 : i32
    %c0_i32_0 = arith.constant 0 : i32
    %c0_i32_1 = arith.constant 0 : i32
    return %c0_i32, %c0_i32_0 : i32, i32
  }
  func.func @transform_4(%arg0: i32) -> (i32, i32) {
    %c0_i32 = arith.constant 0 : i32
    %c0_i32_0 = arith.constant 0 : i32
    %c0_i32_1 = arith.constant 0 : i32
    return %c0_i32, %c0_i32_0 : i32, i32
  }
  func.func @transform_5(%arg0: i32) -> (i32, i32) {
    %c0_i32 = arith.constant 0 : i32
    %c0_i32_0 = arith.constant 0 : i32
    %c0_i32_1 = arith.constant 0 : i32
    return %c0_i32, %c0_i32_0 : i32, i32
  }
  func.func @transform_6(%arg0: i32) -> i32 {
    %c0_i32 = arith.constant 0 : i32
    %c0_i32_0 = arith.constant 0 : i32
    return %c0_i32 : i32
  }
  func.func @transform_7(%arg0: i32) -> (i32, i32) {
    %c0_i32 = arith.constant 0 : i32
    %c0_i32_0 = arith.constant 0 : i32
    return %arg0, %c0_i32 : i32, i32
  }
}

</mosaic_0001>

<bundles_post_ra>
// kernel: tpu_custom_call.1
= control target key start
LH: loop header
LB: loop body
LE: loop exit
PB: predicated region body
PF: predicated region fallthrough
CT: control target
= control target key end

     0   :  { %13 = vsyncpa [#allocation4], 0  ;;  %s848_s0 = inlined_call_operand.vmem [shape: f32[8,128], index: 0, kind: input, shape index: {}]   ;;  %s849_s1 = inlined_call_operand.vmem [shape: f32[8,128], index: 1, kind: input, shape index: {}]   ;;  %s850_s2 = inlined_call_operand.vmem [shape: f32[128,256], index: 2, kind: input, shape index: {}]   ;;  %s851_s3 = inlined_call_operand.hbm [shape: f32[128,256], index: 3, kind: input, shape index: {}]   ;;  %s852_s4 = inlined_call_operand.vmem [shape: f32[1,256], index: 4, kind: input, shape index: {}]   ;;  %s853_s5 = inlined_call_operand.vmem [shape: f32[256,8], index: 5, kind: input, shape index: {}]   ;;  %s854_s6 = inlined_call_operand.<no memory space> [shape: f32[1], index: 6, kind: input, shape index: {}]   ;;  %s855_s7 = inlined_call_operand.hbm [shape: f32[8,8], index: 7, kind: output, shape index: {}]  }
   0x1   :  { %14 = vsyncpa [#allocation5], 0  ;;  %s573_s24 = smov [#allocation3]   ;;  %s525_s28 = scalar_lea.hbm %s851_s3, 4096 }
   0x2   :  { %s26_s25 = sshll.u32 %s573_s24, 4  ;;  %p526_p0 = scmp.ne.s32.totalorder %s851_s3, %s525_s28  ;;  %s27_s25 = int_to_ptr.vmem [resolvable:$true] %s26_s25 }
   0x3   :  { %p529_p1 = scmp.lt.u32.totalorder %s525_s28, %s851_s3 }
   0x5   :  { %p531_p2 = pnand %p529_p1, %p526_p0 }
   0x7   :  { %534 = shalt.err (!%p531_p2)
}
   0x8   :  { %s535_s10 = scalar_lea.vmem %s27_s25, 4096  ;;  %p540_p4 = scmp.lt.s32.totalorder %s27_s25, %s27_s25 }
   0x9   :  { %p536_p3 = scmp.ne.s32.totalorder %s27_s25, %s535_s10  ;;  %p541_p5 = scmp.lt.s32.totalorder %s535_s10, %s535_s10 }
   0xb   :  { %p542_p6 = por %p541_p5, %p540_p4 }
   0xd   :  { %p543_p7 = pnand %p542_p6, %p536_p3 }
   0xf   :  { %546 = shalt.err (!%p543_p7)
}
  0x10   :  { %s574_s11 = smov 256   ;;  %s575_s12 = smov 16  }
  0x11   :  { %32 = dma.hbm_to_vmem [thread:$0]  %s851_s3, 4096, %s27_s25, [#allocation4], %s574_s11, %s574_s11, %s575_s12  }
  0x12   :  { %569 = dma.done.wait [#allocation4], 4096  }
  0x13   :  { %570 = vsyncadd [#allocation4], 4294963200  ;;  %v576_v0 = vmov 0.0   ;;  %v77_v1 = vld [vmem:[#allocation3 + $0x8] sm:$0xff]  ;;  %v79_v2 = vld [vmem:[#allocation3 + $0x18] sm:$0xff]  ;;  %s577_s23 = smov [#allocation6]  }
  0x14   :  { %172 = vmatprep.mubr.f32.mxu0 %v576_v0  ;;  %v76_v3 = vld [vmem:[#allocation3] sm:$0xff]  ;;  %v422_v4 = vpack.c.bf16 %v79_v2, %v77_v1  ;;  %v78_v5 = vld [vmem:[#allocation3 + $0x10] sm:$0xff]  ;;  %v81_v6 = vld [vmem:[#allocation3 + $0x28] sm:$0xff]  ;;  %s378_s24 = sshll.u32 %s577_s23, 4  ;;  %vm370_vm0 = vcmask 64512   ;;  %s379_s24 = int_to_ptr.vmem [resolvable:$true] %s378_s24 }
  0x15   :  { %v83_v7 = vld [vmem:[#allocation3 + $0x38] sm:$0xff]  ;;  %v424_v8 = vpack.c.bf16 %v78_v5, %v76_v3  ;;  %v80_v10 = vld [vmem:[#allocation3 + $0x20] sm:$0xff]  ;;  %v82_v11 = vld [vmem:[#allocation3 + $0x30] sm:$0xff]  ;;  %p552_p9 = scmp.lt.s32.totalorder %s379_s24, %s379_s24 }
  0x16   :  { %v426_v9 = vpack.c.bf16 %v83_v7, %v81_v6  ;;  %v85_v12 = vld [vmem:[#allocation3 + $0x48] sm:$0xff]  ;;  %423 = vmatprep.subr.bf16.mxu0 %v422_v4  ;;  %v87_v13 = vld [vmem:[#allocation3 + $0x58] sm:$0xff]  ;;  %v428_v14 = vpack.c.bf16 %v82_v11, %v80_v10  ;;  %v84_v16 = vld [vmem:[#allocation3 + $0x40] sm:$0xff] }
  0x17   :  { %425 = vmatpush1.bf16.msra.mxu0 %v424_v8  ;;  %v430_v15 = vpack.c.bf16 %v87_v13, %v85_v12  ;;  %v86_v17 = vld [vmem:[#allocation3 + $0x50] sm:$0xff]  ;;  %v89_v18 = vld [vmem:[#allocation3 + $0x68] sm:$0xff]  ;;  %v91_v19 = vld [vmem:[#allocation3 + $0x78] sm:$0xff] }
  0x18   :  { %427 = vmatprep.subr.bf16.mxu0 %v426_v9  ;;  %v432_v20 = vpack.c.bf16 %v86_v17, %v84_v16  ;;  %v434_v21 = vpack.c.bf16 %v91_v19, %v89_v18  ;;  %v88_v22 = vld [vmem:[#allocation3 + $0x60] sm:$0xff]  ;;  %v90_v23 = vld [vmem:[#allocation3 + $0x70] sm:$0xff]  ;;  %v93_v24 = vld [vmem:[#allocation3 + $0x88] sm:$0xff] }
  0x19   :  { %v95_v25 = vld [vmem:[#allocation3 + $0x98] sm:$0xff]  ;;  %v436_v26 = vpack.c.bf16 %v90_v23, %v88_v22  ;;  %v92_v28 = vld [vmem:[#allocation3 + $0x80] sm:$0xff]  ;;  %v94_v29 = vld [vmem:[#allocation3 + $0x90] sm:$0xff] }
  0x1a   :  { %v438_v27 = vpack.c.bf16 %v95_v25, %v93_v24  ;;  %v97_v30 = vld [vmem:[#allocation3 + $0xa8] sm:$0xff]  ;;  %v99_v31 = vld [vmem:[#allocation3 + $0xb8] sm:$0xff]  ;;  %v440_v32 = vpack.c.bf16 %v94_v29, %v92_v28  ;;  %v96_v34 = vld [vmem:[#allocation3 + $0xa0] sm:$0xff] }
  0x1b   :  { %429 = vmatpush1.bf16.msra.mxu0 %v428_v14  ;;  %v442_v33 = vpack.c.bf16 %v99_v31, %v97_v30  ;;  %v98_v35 = vld [vmem:[#allocation3 + $0xb0] sm:$0xff]  ;;  %v101_v36 = vld [vmem:[#allocation3 + $0xc8] sm:$0xff]  ;;  %v103_v37 = vld [vmem:[#allocation3 + $0xd8] sm:$0xff] }
  0x1c   :  { %431 = vmatprep.subr.bf16.mxu0 %v430_v15  ;;  %v444_v38 = vpack.c.bf16 %v98_v35, %v96_v34  ;;  %v100_v39 = vld [vmem:[#allocation3 + $0xc0] sm:$0xff]  ;;  %v446_v40 = vpack.c.bf16 %v103_v37, %v101_v36  ;;  %v102_v41 = vld [vmem:[#allocation3 + $0xd0] sm:$0xff]  ;;  %v105_v42 = vld [vmem:[#allocation3 + $0xe8] sm:$0xff] }
  0x1d   :  { %v107_v43 = vld [vmem:[#allocation3 + $0xf8] sm:$0xff]  ;;  %v282_v44 = vld [vmem:[%s853_s5 + $0x80] sm:$0xff]  ;;  %v283_v45 = vld [vmem:[%s853_s5 + $0x88] sm:$0xff]  ;;  %v448_v51 = vpack.c.bf16 %v102_v41, %v100_v39 }
  0x1e   :  { %v266_v46 = vld [vmem:[%s853_s5] sm:$0xff]  ;;  %v486_v47 = vpack.c.bf16 %v283_v45, %v282_v44  ;;  %v267_v48 = vld [vmem:[%s853_s5 + $0x8] sm:$0xff]  ;;  %v284_v49 = vld [vmem:[%s853_s5 + $0x90] sm:$0xff]  ;;  %v450_v57 = vpack.c.bf16 %v107_v43, %v105_v42 }
  0x1f   :  { %433 = vmatpush1.bf16.msra.mxu0 %v432_v20  ;;  %v285_v50 = vld [vmem:[%s853_s5 + $0x98] sm:$0xff]  ;;  %v488_v52 = vpack.c.bf16 %v267_v48, %v266_v46  ;;  %v268_v54 = vld [vmem:[%s853_s5 + $0x10] sm:$0xff]  ;;  %v286_v56 = vld [vmem:[%s853_s5 + $0xa0] sm:$0xff] }
  0x20   :  { %435 = vmatprep.subr.bf16.mxu0 %v434_v21  ;;  %v490_v53 = vpack.c.bf16 %v285_v50, %v284_v49  ;;  %v269_v55 = vld [vmem:[%s853_s5 + $0x18] sm:$0xff]  ;;  %v104_v58 = vld [vmem:[#allocation3 + $0xe0] sm:$0xff]  ;;  %v106_v59 = vld [vmem:[#allocation3 + $0xf0] sm:$0xff]  ;;  %487 = vmatprep.subr.bf16.mxu1 %v486_v47 }
  0x21   :  { %v287_v60 = vld [vmem:[%s853_s5 + $0xa8] sm:$0xff]  ;;  %v46_v62 = vld [vmem:[%s850_s2 + $0x18] sm:$0xff]  ;;  %489 = vmatpush3.bf16.msra.mxu1 %v488_v52  ;;  %v492_v63 = vpack.c.bf16 %v269_v55, %v268_v54  ;;  %v270_v2 = vld [vmem:[%s853_s5 + $0x20] sm:$0xff]  ;;  %v452_v4 = vpack.c.bf16 %v106_v59, %v104_v58 }
  0x22   :  { %v44_v61 = vld [vmem:[%s850_s2 + $0x8] sm:$0xff]  ;;  %491 = vmatprep.subr.bf16.mxu1 %v490_v53  ;;  %v494_v1 = vpack.c.bf16 %v287_v60, %v286_v56  ;;  %v288_v5 = vld [vmem:[%s853_s5 + $0xb0] sm:$0xff]  ;;  %v289_v6 = vld [vmem:[%s853_s5 + $0xb8] sm:$0xff] }
  0x23   :  { %437 = vmatpush1.bf16.msra.mxu0 %v436_v26  ;;  %v271_v3 = vld [vmem:[%s853_s5 + $0x28] sm:$0xff]  ;;  %v454_v7 = vpack.c.bf16 %v46_v62, %v44_v61  ;;  %v43_v8 = vld [vmem:[%s850_s2] sm:$0xff]  ;;  %v45_v9 = vld [vmem:[%s850_s2 + $0x10] sm:$0xff]  ;;  %v498_v13 = vpack.c.bf16 %v289_v6, %v288_v5 }
  0x24   :  { %439 = vmatprep.subr.bf16.mxu0 %v438_v27  ;;  %v48_v10 = vld [vmem:[%s850_s2 + $0x28] sm:$0xff]  ;;  %v50_v11 = vld [vmem:[%s850_s2 + $0x38] sm:$0xff]  ;;  %v496_v12 = vpack.c.bf16 %v271_v3, %v270_v2  ;;  %v272_v14 = vld [vmem:[%s853_s5 + $0x30] sm:$0xff]  ;;  %v456_v17 = vpack.c.bf16 %v45_v9, %v43_v8 }
  0x25   :  { %493 = vmatpush3.bf16.msra.mxu1 %v492_v63  ;;  %v273_v15 = vld [vmem:[%s853_s5 + $0x38] sm:$0xff]  ;;  %v75_v16 = vld [vmem:[%s849_s1] sm:$0xff]  ;;  %v291_v19 = vld [vmem:[%s853_s5 + $0xc8] sm:$0xff]  ;;  %v458_v20 = vpack.c.bf16 %v50_v11, %v48_v10 }
  0x26   :  { %495 = vmatprep.subr.bf16.mxu1 %v494_v1  ;;  %v290_v18 = vld [vmem:[%s853_s5 + $0xc0] sm:$0xff]  ;;  %v49_v22 = vld [vmem:[%s850_s2 + $0x30] sm:$0xff]  ;;  %v52_v23 = vld [vmem:[%s850_s2 + $0x48] sm:$0xff]  ;;  %v500_v25 = vpack.c.bf16 %v273_v15, %v272_v14 }
  0x27   :  { %441 = vmatpush1.bf16.msra.mxu0 %v440_v32  ;;  %v47_v21 = vld [vmem:[%s850_s2 + $0x20] sm:$0xff]  ;;  %v54_v24 = vld [vmem:[%s850_s2 + $0x58] sm:$0xff]  ;;  %v502_v26 = vpack.c.bf16 %v291_v19, %v290_v18  ;;  %v275_v28 = vld [vmem:[%s853_s5 + $0x48] sm:$0xff] }
  0x28   :  { %443 = vmatprep.subr.bf16.mxu0 %v442_v33  ;;  %v274_v27 = vld [vmem:[%s853_s5 + $0x40] sm:$0xff]  ;;  %v460_v29 = vpack.c.bf16 %v49_v22, %v47_v21  ;;  %v292_v30 = vld [vmem:[%s853_s5 + $0xd0] sm:$0xff]  ;;  %v293_v31 = vld [vmem:[%s853_s5 + $0xd8] sm:$0xff]  ;;  %v462_v32 = vpack.c.bf16 %v54_v24, %v52_v23 }
  0x29   :  { %497 = vmatpush3.bf16.msra.mxu1 %v496_v12  ;;  %v51_v33 = vld [vmem:[%s850_s2 + $0x40] sm:$0xff]  ;;  %v53_v34 = vld [vmem:[%s850_s2 + $0x50] sm:$0xff]  ;;  %v58_v35 = vld [vmem:[%s850_s2 + $0x78] sm:$0xff]  ;;  %v504_v36 = vpack.c.bf16 %v275_v28, %v274_v27  ;;  %v506_v37 = vpack.c.bf16 %v293_v31, %v292_v30 }
  0x2a   :  { %499 = vmatprep.subr.bf16.mxu1 %v498_v13  ;;  %v277_v39 = vld [vmem:[%s853_s5 + $0x58] sm:$0xff]  ;;  %v294_v41 = vld [vmem:[%s853_s5 + $0xe0] sm:$0xff]  ;;  %v295_v42 = vld [vmem:[%s853_s5 + $0xe8] sm:$0xff] }
  0x2b   :  { %445 = vmatpush1.bf16.msra.mxu0 %v444_v38  ;;  %v276_v38 = vld [vmem:[%s853_s5 + $0x50] sm:$0xff]  ;;  %v55_v44 = vld [vmem:[%s850_s2 + $0x60] sm:$0xff]  ;;  %v60_v46 = vld [vmem:[%s850_s2 + $0x88] sm:$0xff]  ;;  %v510_v49 = vpack.c.bf16 %v295_v42, %v294_v41 }
  0x2c   :  { %447 = vmatprep.subr.bf16.mxu0 %v446_v40  ;;  %v464_v40 = vpack.c.bf16 %v53_v34, %v51_v33  ;;  %v57_v45 = vld [vmem:[%s850_s2 + $0x70] sm:$0xff]  ;;  %v62_v47 = vld [vmem:[%s850_s2 + $0x98] sm:$0xff]  ;;  %v508_v48 = vpack.c.bf16 %v277_v39, %v276_v38  ;;  %v59_v52 = vld [vmem:[%s850_s2 + $0x80] sm:$0xff]  ;;  %v299_v34 = vstv %s854_s6 }
  0x2d   :  { %501 = vmatpush3.bf16.msra.mxu1 %v500_v25  ;;  %v468_v50 = vpack.c.bf16 %v57_v45, %v55_v44  ;;  %v61_v53 = vld [vmem:[%s850_s2 + $0x90] sm:$0xff]  ;;  %v64_v54 = vld [vmem:[%s850_s2 + $0xa8] sm:$0xff]  ;;  %v66_v55 = vld [vmem:[%s850_s2 + $0xb8] sm:$0xff] }
  0x2e   :  { %503 = vmatprep.subr.bf16.mxu1 %v502_v26  ;;  %v472_v56 = vpack.c.bf16 %v61_v53, %v59_v52  ;;  %v63_v58 = vld [vmem:[%s850_s2 + $0xa0] sm:$0xff]  ;;  %v65_v59 = vld [vmem:[%s850_s2 + $0xb0] sm:$0xff]  ;;  %v68_v60 = vld [vmem:[%s850_s2 + $0xc8] sm:$0xff] }
  0x2f   :  { %449 = vmatpush1.bf16.msra.mxu0 %v448_v51  ;;  %v470_v51 = vpack.c.bf16 %v62_v47, %v60_v46  ;;  %v70_v61 = vld [vmem:[%s850_s2 + $0xd8] sm:$0xff]  ;;  %v476_v62 = vpack.c.bf16 %v65_v59, %v63_v58  ;;  %v67_v1 = vld [vmem:[%s850_s2 + $0xc0] sm:$0xff]  ;;  %v69_v2 = vld [vmem:[%s850_s2 + $0xd0] sm:$0xff] }
  0x30   :  { %451 = vmatprep.subr.bf16.mxu0 %v450_v57  ;;  %v474_v57 = vpack.c.bf16 %v66_v55, %v64_v54  ;;  %v478_v63 = vpack.c.bf16 %v70_v61, %v68_v60  ;;  %v72_v3 = vld [vmem:[%s850_s2 + $0xe8] sm:$0xff]  ;;  %v480_v5 = vpack.c.bf16 %v69_v2, %v67_v1  ;;  %v73_v8 = vld [vmem:[%s850_s2 + $0xf0] sm:$0xff]  ;;  %v42_v10 = vld [vmem:[%s848_s0] sm:$0xff] }
  0x31   :  { %505 = vmatpush3.bf16.msra.mxu1 %v504_v36  ;;  %v278_v11 = vld [vmem:[%s853_s5 + $0x60] sm:$0xff]  ;;  %v279_v12 = vld [vmem:[%s853_s5 + $0x68] sm:$0xff]  ;;  %v296_v14 = vld [vmem:[%s853_s5 + $0xf0] sm:$0xff] }
  0x32   :  { %507 = vmatprep.subr.bf16.mxu1 %v506_v37  ;;  %v512_v13 = vpack.c.bf16 %v279_v12, %v278_v11  ;;  %v297_v15 = vld [vmem:[%s853_s5 + $0xf8] sm:$0xff]  ;;  %v250_v23 = vld [vmem:[%s852_s4] sm:$0x3]  ;;  %s547_s4 = scalar_lea.vmem %s379_s24, 128 }
  0x33   :  { %453 = vmatpush1.bf16.msra.mxu0 %v452_v4  ;;  %v74_v4 = vld [vmem:[%s850_s2 + $0xf8] sm:$0xff]  ;;  %p548_p8 = scmp.ne.s32.totalorder %s379_s24, %s547_s4  ;;  %p553_p10 = scmp.lt.s32.totalorder %s547_s4, %s547_s4 }
  0x34   :  { %455 = vmatprep.subr.bf16.mxu0 %v454_v7  ;;  %v482_v6 = vpack.c.bf16 %v74_v4, %v72_v3  ;;  %v71_v7 = vld [vmem:[%s850_s2 + $0xe0] sm:$0xff]  ;;  %v281_v18 = vld [vmem:[%s853_s5 + $0x78] sm:$0xff] }
  0x35   :  { %509 = vmatpush3.bf16.msra.mxu1 %v508_v48  ;;  %v484_v9 = vpack.c.bf16 %v73_v8, %v71_v7  ;;  %p554_p11 = por %p553_p10, %p552_p9 }
  0x36   :  { %173 = vmatmul.mubr.f32.vlgmr.msra.gmra.mrb[0].mxu0 %v75_v16  ;;  %511 = vmatprep.subr.bf16.mxu1 %v510_v49  ;;  %v514_v16 = vpack.c.bf16 %v297_v15, %v296_v14 }
  0x37   :  { %457 = vmatpush1.bf16.msra.mxu0 %v456_v17  ;;  %243 = vmatprep.mubr.f32.mxu0 %v576_v0  ;;  %v56_v0 = vld [vmem:[%s850_s2 + $0x68] sm:$0xff]  ;;  %v280_v17 = vld [vmem:[%s853_s5 + $0x70] sm:$0xff]  ;;  %p555_p12 = pnand %p554_p11, %p548_p8 }
  0x38   :  { %459 = vmatprep.subr.bf16.mxu0 %v458_v20  ;;  %v466_v43 = vpack.c.bf16 %v58_v35, %v56_v0  ;;  %v516_v19 = vpack.c.bf16 %v281_v18, %v280_v17  ;;  %v252_v20 = vlaneseq }
  0x39   :  { %513 = vmatpush3.bf16.msra.mxu1 %v512_v13 }
  0x3a   :  { %515 = vmatprep.subr.bf16.mxu1 %v514_v16  ;;  %v253_v21 = vshrl.u32 %v252_v20, 7 }
  0x3b   :  { %461 = vmatpush1.bf16.msra.mxu0 %v460_v29 }
  0x3c   :  { %463 = vmatprep.subr.bf16.mxu0 %v462_v32  ;;  %v254_v22 = vsub.s32 0, %v253_v21  ;;  %v258_v24 = vsub.s32 1, %v253_v21 }
  0x3d   :  { %517 = vmatpush3.bf16.msra.mxu1 %v516_v19 }
  0x3e   :  { %v255_v25 = vrot.slane %v250_v23, %v254_v22  ;;  %v259_v26 = vrot.slane %v250_v23, %v258_v24 }
  0x3f   :  { %465 = vmatpush1.bf16.msra.mxu0 %v464_v40 }
  0x40   :  { %467 = vmatprep.subr.bf16.mxu0 %v466_v43 }
  0x43   :  { %469 = vmatpush1.bf16.msra.mxu0 %v468_v50 }
  0x44   :  { %471 = vmatprep.subr.bf16.mxu0 %v470_v51 }
  0x47   :  { %473 = vmatpush1.bf16.msra.mxu0 %v472_v56 }
  0x48   :  { %475 = vmatprep.subr.bf16.mxu0 %v474_v57 }
  0x4b   :  { %477 = vmatpush1.bf16.msra.mxu0 %v476_v62 }
  0x4c   :  { %479 = vmatprep.subr.bf16.mxu0 %v478_v63 }
  0x4f   :  { %481 = vmatpush1.bf16.msra.mxu0 %v480_v5 }
  0x50   :  { %483 = vmatprep.subr.bf16.mxu0 %v482_v6 }
  0x53   :  { %485 = vmatpush1.bf16.msra.mxu0 %v484_v9 }
  0x56   :  { %244 = vmatmul.mubr.f32.vlgmr.msra.gmra.mrb[0].mxu0 %v42_v10 }
 0x129   :  { %v245_v27 = vpop.f32.mrb[0].mxu0 }
 0x12a   :  { %v262_v28 = vadd.f32 %v255_v25, %v245_v27  ;;  %v247_v29 = vpop.f32.mrb[1].mxu0 }
 0x12b   :  { %v263_v30 = vadd.f32 %v259_v26, %v247_v29 }
 0x12c   :  { %v264_v32 = vmax.f32 %v262_v28, 0.0 }
 0x12d   :  { %v265_v31 = vmax.f32 %v263_v30, 0.0 }
 0x12f   :  { %364 = vmatprep.mubr.f32.mxu1 %v265_v31 }
 0x130   :  { %365 = vmatmul.mubr.f32.vlgmr.msra.gmra.mrb[0].mxu1 %v264_v32 }
 0x203   :  { %v419_v33 = vpop.f32.mrb[0].mxu1 }
 0x204   :  { %v420_v0 = vpop.f32.mrb[1].mxu1 }
 0x205   :  { %v421_v35 = vadd.f32 %v420_v0, %v419_v33 }
 0x207   :  { %v367_v36 = vadd.f32 %v421_v35, %v299_v34 }
 0x209   :  { %371 = vst.msk [vmem:[#allocation6] sm:$0xff] %vm370_vm0, %v367_v36 }
 0x20a   :  { %558 = shalt.err (!%p555_p12)
}
 0x20b   :  { %s559_s27 = scalar_lea.hbm %s855_s7, 128 }
 0x20c   :  { %p560_p13 = scmp.ne.s32.totalorder %s855_s7, %s559_s27  ;;  %p563_p0 = scmp.lt.u32.totalorder %s559_s27, %s855_s7 }
 0x20e   :  { %p565_p1 = pnand %p563_p0, %p560_p13 }
 0x210   :  { %568 = shalt.err (!%p565_p1)
}
 0x211   :  { %381 = dma.vmem_to_hbm [thread:$0]  %s379_s24, 128, %s855_s7, [#allocation5]  }
 0x212   :  { %571 = dma.done.wait [#allocation5], 128  }
 0x213   :  { %572 = vsyncadd [#allocation5], 4294967168 }
 0x214   :  { %385 = vsyncpa [#allocation4], 1 }
 0x215   :  { %386 = vsyncpa [#allocation5], 1 }

</bundles_post_ra>
